<compile_context>
chip_gen: v6e
topology: v6e:2x2x1
jax: 0.10.0
libtpu: 0.0.40
codegen_flags: <defaults>
</compile_context>

<pallas_src>
import functools

import jax
import jax.numpy as jnp
from jax.experimental import pallas as pl
from jax.experimental.pallas import tpu as pltpu


def _round_up(x, m):
    return (x + m - 1) // m * m


def _odl_kernel(x_ref, wh0_ref, bh0_ref, wcat_ref, bcat_ref, out_ref, *,
                num_layers, hidden, n_classes, pad_cols):
    """Fused ODL forward for one batch tile.

    x_ref    : (TB, F)            compute dtype
    wh0_ref  : (F, H)             compute dtype
    bh0_ref  : (1, H)             f32
    wcat_ref : (L, H, H + C)      compute dtype   [:, :, :H] = Wh_{i+1} (0 for last)
                                                  [:, :, H:] = Wo_i
    bcat_ref : (L, 1, H + C)      f32             same column layout as wcat
    out_ref  : (TB, L*C + pad)    f32             lane-dense packed heads
    """
    cdtype = wcat_ref.dtype
    tb = x_ref.shape[0]

    # First hidden layer (f32 accumulation on the MXU), bias + ReLU on the VPU.
    h = jnp.dot(x_ref[...], wh0_ref[...], preferred_element_type=jnp.float32)
    h = jnp.maximum(h + bh0_ref[...], 0.0)

    head_outs = []
    # num_layers is small & static -> fully unrolled.
    for i in range(num_layers):
        y = jnp.dot(h.astype(cdtype), wcat_ref[i],
                    preferred_element_type=jnp.float32)
        y = y + bcat_ref[i]
        # Head for layer i lives in columns [H, H+C).
        head_outs.append(y[:, hidden:hidden + n_classes])
        if i + 1 < num_layers:
            # Next hidden activation lives lane-aligned in columns [0, H).
            h = jnp.maximum(y[:, :hidden], 0.0)

    if pad_cols > 0:
        head_outs.append(jnp.zeros((tb, pad_cols), jnp.float32))

    # Single lane-dense (128-multiple) store of all heads.
    out_ref[...] = jnp.concatenate(head_outs, axis=-1)


def odl_forward(x, wh0, bh0, wh, bh, wo, bo, *,
                block_batch=128, compute_dtype=jnp.float32):
    """Pallas ODL forward.

    x   : (B, F)        wh0 : (F, H)       bh0 : (H,)
    wh  : (L-1, H, H)   bh  : (L-1, H)      (layer i>=1 hidden weights, (in,out))
    wo  : (L, H, C)     bo  : (L, C)        (per-layer output heads, (in,out))
    Returns (L, B, C) float32, matching torch.stack(output_class).
    """
    num_layers, hidden, n_classes = wo.shape
    batch, features = x.shape

    # ---- batch tiling (grid axis 0, "parallel") ------------------------------
    tb = min(block_batch, _round_up(batch, 8))
    b_pad = _round_up(batch, tb)
    if b_pad != batch:
        x = jnp.pad(x, ((0, b_pad - batch), (0, 0)))

    # ---- fused weight prep ---------------------------------------------------
    # wcat[i] = [ Wh_{i+1} | Wo_i ]  with a zero hidden block for the last layer.
    wh_pad = jnp.concatenate(
        [wh, jnp.zeros((1, hidden, hidden), wh.dtype)], axis=0)          # (L,H,H)
    bh_pad = jnp.concatenate(
        [bh, jnp.zeros((1, hidden), bh.dtype)], axis=0)                  # (L,H)
    wcat = jnp.concatenate([wh_pad, wo], axis=-1)                        # (L,H,H+C)
    bcat = jnp.concatenate([bh_pad, bo], axis=-1)[:, None, :]            # (L,1,H+C)
    bcat = bcat.astype(jnp.float32)

    x_c = x.astype(compute_dtype)
    wh0_c = wh0.astype(compute_dtype)
    wcat_c = wcat.astype(compute_dtype)
    bh0_2d = bh0.reshape(1, hidden).astype(jnp.float32)

    grid = (b_pad // tb,)
    out_cols = num_layers * n_classes
    # Lane-dense output slab: pad to a 128-lane multiple so the store is an
    # unmasked full-width vst instead of a masked partial store.
    out_cols_pad = _round_up(out_cols, 128)
    pad_cols = out_cols_pad - out_cols

    flops = 2 * b_pad * (features * hidden
                         + num_layers * hidden * (hidden + n_classes))
    bytes_accessed = (
        x_c.size * x_c.dtype.itemsize
        + wh0_c.size * wh0_c.dtype.itemsize
        + bh0_2d.size * 4
        + wcat_c.size * wcat_c.dtype.itemsize
        + bcat.size * 4
        + b_pad * out_cols_pad * 4
    )

    kernel = functools.partial(
        _odl_kernel, num_layers=num_layers, hidden=hidden,
        n_classes=n_classes, pad_cols=pad_cols)

    out_flat = pl.pallas_call(
        kernel,
        out_shape=jax.ShapeDtypeStruct((b_pad, out_cols_pad), jnp.float32),
        grid_spec=pltpu.PrefetchScalarGridSpec(
            num_scalar_prefetch=0,
            grid=grid,
            in_specs=[
                pl.BlockSpec((tb, features), lambda i: (i, 0)),
                pl.BlockSpec((features, hidden), lambda i: (0, 0)),
                pl.BlockSpec((1, hidden), lambda i: (0, 0)),
                pl.BlockSpec((num_layers, hidden, hidden + n_classes),
                             lambda i: (0, 0, 0)),
                pl.BlockSpec((num_layers, 1, hidden + n_classes),
                             lambda i: (0, 0, 0)),
            ],
            out_specs=pl.BlockSpec((tb, out_cols_pad), lambda i: (i, 0)),
        ),
        compiler_params=pltpu.CompilerParams(
            dimension_semantics=("parallel",),
            vmem_limit_bytes=32 * 1024 * 1024,
        ),
        cost_estimate=pl.CostEstimate(
            flops=int(flops), transcendentals=0, bytes_accessed=int(bytes_accessed)),
    )(x_c, wh0_c, bh0_2d, wcat_c, bcat)

    # (B_pad, L*C_pad) -> (B, L, C) -> (L, B, C) to match torch.stack ordering.
    out = out_flat[:batch, :out_cols].reshape(batch, num_layers, n_classes)
    return jnp.transpose(out, (1, 0, 2))


def _torch_linear_init(key, fan_in, fan_out):
    """Deterministic init mimicking nn.Linear default: U(-1/sqrt(fan_in), 1/sqrt(fan_in))."""
    kw, kb = jax.random.split(key)
    bound = 1.0 / jnp.sqrt(float(fan_in))
    w = jax.random.uniform(kw, (fan_in, fan_out), jnp.float32, -bound, bound)
    b = jax.random.uniform(kb, (fan_out,), jnp.float32, -bound, bound)
    return w, b


def _reference_forward(x, wh0, bh0, wh, bh, wo, bo):
    """Pure-JAX reference mirroring the PyTorch forward."""
    num_layers = wo.shape[0]
    hiddens = []
    h = jnp.maximum(x @ wh0 + bh0, 0.0)
    hiddens.append(h)
    for i in range(1, num_layers):
        h = jnp.maximum(h @ wh[i - 1] + bh[i - 1], 0.0)
        hiddens.append(h)
    outs = [hiddens[i] @ wo[i] + bo[i] for i in range(num_layers)]
    return jnp.stack(outs)


if __name__ == "__main__":
    # Small ODL config: features_size=16, max_num_hidden_layers=4,
    # qtd_neuron_per_hidden_layer=32, n_classes=8, batch_size=2.
    features_size = 16
    max_num_hidden_layers = 4
    hidden = 32
    n_classes = 8
    batch = 2

    key = jax.random.PRNGKey(0)
    keys = jax.random.split(key, 2 * max_num_hidden_layers + 1)

    x = jax.random.normal(keys[0], (batch, features_size), jnp.float32)

    # Hidden layers: first (F -> H), rest (H -> H).
    wh0, bh0 = _torch_linear_init(keys[1], features_size, hidden)
    wh_list, bh_list = [], []
    for i in range(1, max_num_hidden_layers):
        w, b = _torch_linear_init(keys[1 + i], hidden, hidden)
        wh_list.append(w)
        bh_list.append(b)
    wh = jnp.stack(wh_list)          # (L-1, H, H)
    bh = jnp.stack(bh_list)          # (L-1, H)

    # Output heads: (H -> C) per hidden layer.
    wo_list, bo_list = [], []
    for i in range(max_num_hidden_layers):
        w, b = _torch_linear_init(keys[1 + max_num_hidden_layers + i], hidden, n_classes)
        wo_list.append(w)
        bo_list.append(b)
    wo = jnp.stack(wo_list)          # (L, H, C)
    bo = jnp.stack(bo_list)          # (L, C)

    ref = _reference_forward(x, wh0, bh0, wh, bh, wo, bo)

    # f32 path (default): must match the reference tightly.
    pred_f32 = odl_forward(x, wh0, bh0, wh, bh, wo, bo)
    pred_f32 = jax.block_until_ready(pred_f32)
    assert pred_f32.shape == (max_num_hidden_layers, batch, n_classes)
    assert jnp.allclose(pred_f32, ref, atol=1e-5, rtol=1e-5)

    # bf16 compute path (v6e/v7x MXU-native): looser tolerance.
    pred_bf16 = odl_forward(x, wh0, bh0, wh, bh, wo, bo,
                            compute_dtype=jnp.bfloat16)
    pred_bf16 = jax.block_until_ready(pred_bf16)
    assert jnp.allclose(pred_bf16, ref, atol=5e-2, rtol=5e-2)

    print("KERNEL_OK")
</pallas_src>

<mosaic_0001>
module attributes {stable_mosaic.version = 11 : i64} {
  func.func @_odl_kernel(%arg0: i32, %arg1: memref<8x16xf32, #tpu.memory_space<vmem>>, %arg2: memref<16x32xf32, #tpu.memory_space<vmem>>, %arg3: memref<1x32xf32, #tpu.memory_space<vmem>>, %arg4: memref<4x32x40xf32, #tpu.memory_space<vmem>>, %arg5: memref<4x1x40xf32, #tpu.memory_space<vmem>>, %arg6: memref<8x128xf32, #tpu.memory_space<vmem>>) attributes {dimension_semantics = [#tpu.dimension_semantics<parallel>], iteration_bounds = array<i64: 1>, scalar_prefetch = 0 : i64, scratch_operands = 0 : i64, tpu.core_type = #tpu.core_type<tc>, window_params = [{transform_indices = @transform_0, window_bounds = array<i64: 8, 16>}, {pipeline_mode = #tpu.pipeline_mode<synchronous>, transform_indices = @transform_1, window_bounds = array<i64: 16, 32>}, {pipeline_mode = #tpu.pipeline_mode<synchronous>, transform_indices = @transform_2, window_bounds = array<i64: 1, 32>}, {pipeline_mode = #tpu.pipeline_mode<synchronous>, transform_indices = @transform_3, window_bounds = array<i64: 4, 32, 40>}, {pipeline_mode = #tpu.pipeline_mode<synchronous>, transform_indices = @transform_4, window_bounds = array<i64: 4, 1, 40>}, {transform_indices = @transform_5, window_bounds = array<i64: 8, 128>}]} {
    %c0 = arith.constant 0 : index
    %c0_0 = arith.constant 0 : index
    %0 = vector.load %arg1[%c0, %c0_0] : memref<8x16xf32, #tpu.memory_space<vmem>>, vector<8x16xf32>
    %c0_1 = arith.constant 0 : index
    %c0_2 = arith.constant 0 : index
    %1 = vector.load %arg2[%c0_1, %c0_2] : memref<16x32xf32, #tpu.memory_space<vmem>>, vector<16x32xf32>
    %cst = arith.constant dense<0.000000e+00> : vector<8x32xf32>
    %2 = tpu.matmul %0, %1, %cst {dimension_numbers = #tpu.dot_dimension_numbers<[1], [0], [0], [1], [0, 0, 1, 1], [], []>} : vector<8x16xf32>, vector<16x32xf32>, vector<8x32xf32> -> vector<8x32xf32>
    %c0_3 = arith.constant 0 : index
    %c0_4 = arith.constant 0 : index
    %3 = vector.load %arg3[%c0_3, %c0_4] : memref<1x32xf32, #tpu.memory_space<vmem>>, vector<1x32xf32>
    %4 = vector.broadcast %3 : vector<1x32xf32> to vector<8x32xf32>
    %5 = arith.addf %2, %4 : vector<8x32xf32>
    %cst_5 = arith.constant 0.000000e+00 : f32
    %6 = vector.broadcast %cst_5 : f32 to vector<8x32xf32>
    %7 = arith.maximumf %5, %6 : vector<8x32xf32>
    %c0_6 = arith.constant 0 : index
    %c0_7 = arith.constant 0 : index
    %c0_8 = arith.constant 0 : index
    %8 = vector.load %arg4[%c0_6, %c0_7, %c0_8] : memref<4x32x40xf32, #tpu.memory_space<vmem>>, vector<1x32x40xf32>
    %9 = vector.shape_cast %8 : vector<1x32x40xf32> to vector<32x40xf32>
    %cst_9 = arith.constant dense<0.000000e+00> : vector<8x40xf32>
    %10 = tpu.matmul %7, %9, %cst_9 {dimension_numbers = #tpu.dot_dimension_numbers<[1], [0], [0], [1], [0, 0, 1, 1], [], []>} : vector<8x32xf32>, vector<32x40xf32>, vector<8x40xf32> -> vector<8x40xf32>
    %c0_10 = arith.constant 0 : index
    %c0_11 = arith.constant 0 : index
    %c0_12 = arith.constant 0 : index
    %11 = vector.load %arg5[%c0_10, %c0_11, %c0_12] : memref<4x1x40xf32, #tpu.memory_space<vmem>>, vector<1x1x40xf32>
    %12 = vector.shape_cast %11 : vector<1x1x40xf32> to vector<1x40xf32>
    %13 = vector.broadcast %12 : vector<1x40xf32> to vector<8x40xf32>
    %14 = arith.addf %10, %13 : vector<8x40xf32>
    %15 = vector.extract_strided_slice %14 {offsets = [0, 32], sizes = [8, 8], strides = [1, 1]} : vector<8x40xf32> to vector<8x8xf32>
    %16 = vector.extract_strided_slice %14 {offsets = [0, 0], sizes = [8, 32], strides = [1, 1]} : vector<8x40xf32> to vector<8x32xf32>
    %cst_13 = arith.constant 0.000000e+00 : f32
    %17 = vector.broadcast %cst_13 : f32 to vector<8x32xf32>
    %18 = arith.maximumf %16, %17 : vector<8x32xf32>
    %c1 = arith.constant 1 : index
    %c0_14 = arith.constant 0 : index
    %c0_15 = arith.constant 0 : index
    %19 = vector.load %arg4[%c1, %c0_14, %c0_15] : memref<4x32x40xf32, #tpu.memory_space<vmem>>, vector<1x32x40xf32>
    %20 = vector.shape_cast %19 : vector<1x32x40xf32> to vector<32x40xf32>
    %cst_16 = arith.constant dense<0.000000e+00> : vector<8x40xf32>
    %21 = tpu.matmul %18, %20, %cst_16 {dimension_numbers = #tpu.dot_dimension_numbers<[1], [0], [0], [1], [0, 0, 1, 1], [], []>} : vector<8x32xf32>, vector<32x40xf32>, vector<8x40xf32> -> vector<8x40xf32>
    %c1_17 = arith.constant 1 : index
    %c0_18 = arith.constant 0 : index
    %c0_19 = arith.constant 0 : index
    %22 = vector.load %arg5[%c1_17, %c0_18, %c0_19] : memref<4x1x40xf32, #tpu.memory_space<vmem>>, vector<1x1x40xf32>
    %23 = vector.shape_cast %22 : vector<1x1x40xf32> to vector<1x40xf32>
    %24 = vector.broadcast %23 : vector<1x40xf32> to vector<8x40xf32>
    %25 = arith.addf %21, %24 : vector<8x40xf32>
    %26 = vector.extract_strided_slice %25 {offsets = [0, 32], sizes = [8, 8], strides = [1, 1]} : vector<8x40xf32> to vector<8x8xf32>
    %27 = vector.extract_strided_slice %25 {offsets = [0, 0], sizes = [8, 32], strides = [1, 1]} : vector<8x40xf32> to vector<8x32xf32>
    %cst_20 = arith.constant 0.000000e+00 : f32
    %28 = vector.broadcast %cst_20 : f32 to vector<8x32xf32>
    %29 = arith.maximumf %27, %28 : vector<8x32xf32>
    %c2 = arith.constant 2 : index
    %c0_21 = arith.constant 0 : index
    %c0_22 = arith.constant 0 : index
    %30 = vector.load %arg4[%c2, %c0_21, %c0_22] : memref<4x32x40xf32, #tpu.memory_space<vmem>>, vector<1x32x40xf32>
    %31 = vector.shape_cast %30 : vector<1x32x40xf32> to vector<32x40xf32>
    %cst_23 = arith.constant dense<0.000000e+00> : vector<8x40xf32>
    %32 = tpu.matmul %29, %31, %cst_23 {dimension_numbers = #tpu.dot_dimension_numbers<[1], [0], [0], [1], [0, 0, 1, 1], [], []>} : vector<8x32xf32>, vector<32x40xf32>, vector<8x40xf32> -> vector<8x40xf32>
    %c2_24 = arith.constant 2 : index
    %c0_25 = arith.constant 0 : index
    %c0_26 = arith.constant 0 : index
    %33 = vector.load %arg5[%c2_24, %c0_25, %c0_26] : memref<4x1x40xf32, #tpu.memory_space<vmem>>, vector<1x1x40xf32>
    %34 = vector.shape_cast %33 : vector<1x1x40xf32> to vector<1x40xf32>
    %35 = vector.broadcast %34 : vector<1x40xf32> to vector<8x40xf32>
    %36 = arith.addf %32, %35 : vector<8x40xf32>
    %37 = vector.extract_strided_slice %36 {offsets = [0, 32], sizes = [8, 8], strides = [1, 1]} : vector<8x40xf32> to vector<8x8xf32>
    %38 = vector.extract_strided_slice %36 {offsets = [0, 0], sizes = [8, 32], strides = [1, 1]} : vector<8x40xf32> to vector<8x32xf32>
    %cst_27 = arith.constant 0.000000e+00 : f32
    %39 = vector.broadcast %cst_27 : f32 to vector<8x32xf32>
    %40 = arith.maximumf %38, %39 : vector<8x32xf32>
    %c3 = arith.constant 3 : index
    %c0_28 = arith.constant 0 : index
    %c0_29 = arith.constant 0 : index
    %41 = vector.load %arg4[%c3, %c0_28, %c0_29] : memref<4x32x40xf32, #tpu.memory_space<vmem>>, vector<1x32x40xf32>
    %42 = vector.shape_cast %41 : vector<1x32x40xf32> to vector<32x40xf32>
    %cst_30 = arith.constant dense<0.000000e+00> : vector<8x40xf32>
    %43 = tpu.matmul %40, %42, %cst_30 {dimension_numbers = #tpu.dot_dimension_numbers<[1], [0], [0], [1], [0, 0, 1, 1], [], []>} : vector<8x32xf32>, vector<32x40xf32>, vector<8x40xf32> -> vector<8x40xf32>
    %c3_31 = arith.constant 3 : index
    %c0_32 = arith.constant 0 : index
    %c0_33 = arith.constant 0 : index
    %44 = vector.load %arg5[%c3_31, %c0_32, %c0_33] : memref<4x1x40xf32, #tpu.memory_space<vmem>>, vector<1x1x40xf32>
    %45 = vector.shape_cast %44 : vector<1x1x40xf32> to vector<1x40xf32>
    %46 = vector.broadcast %45 : vector<1x40xf32> to vector<8x40xf32>
    %47 = arith.addf %43, %46 : vector<8x40xf32>
    %48 = vector.extract_strided_slice %47 {offsets = [0, 32], sizes = [8, 8], strides = [1, 1]} : vector<8x40xf32> to vector<8x8xf32>
    %cst_34 = arith.constant 0.000000e+00 : f32
    %49 = vector.broadcast %cst_34 : f32 to vector<8x96xf32>
    %50 = tpu.concatenate %15, %26, %37, %48, %49 in 1 : vector<8x8xf32>, vector<8x8xf32>, vector<8x8xf32>, vector<8x8xf32>, vector<8x96xf32> -> vector<8x128xf32>
    %c0_35 = arith.constant 0 : index
    %c0_36 = arith.constant 0 : index
    %51 = vector.load %arg6[%c0_35, %c0_36] : memref<8x128xf32, #tpu.memory_space<vmem>>, vector<8x128xf32>
    tpu.vector_store %arg6[%c0_35, %c0_36], %50 {strides = array<i32>} : memref<8x128xf32, #tpu.memory_space<vmem>>, vector<8x128xf32>,
    return
  }
  func.func @transform_0(%arg0: i32) -> (i32, i32) {
    %c0_i32 = arith.constant 0 : i32
    %c0_i32_0 = arith.constant 0 : i32
    return %arg0, %c0_i32 : i32, i32
  }
  func.func @transform_1(%arg0: i32) -> (i32, i32) {
    %c0_i32 = arith.constant 0 : i32
    %c0_i32_0 = arith.constant 0 : i32
    %c0_i32_1 = arith.constant 0 : i32
    return %c0_i32, %c0_i32_0 : i32, i32
  }
  func.func @transform_2(%arg0: i32) -> (i32, i32) {
    %c0_i32 = arith.constant 0 : i32
    %c0_i32_0 = arith.constant 0 : i32
    %c0_i32_1 = arith.constant 0 : i32
    return %c0_i32, %c0_i32_0 : i32, i32
  }
  func.func @transform_3(%arg0: i32) -> (i32, i32, i32) {
    %c0_i32 = arith.constant 0 : i32
    %c0_i32_0 = arith.constant 0 : i32
    %c0_i32_1 = arith.constant 0 : i32
    %c0_i32_2 = arith.constant 0 : i32
    return %c0_i32, %c0_i32_0, %c0_i32_1 : i32, i32, i32
  }
  func.func @transform_4(%arg0: i32) -> (i32, i32, i32) {
    %c0_i32 = arith.constant 0 : i32
    %c0_i32_0 = arith.constant 0 : i32
    %c0_i32_1 = arith.constant 0 : i32
    %c0_i32_2 = arith.constant 0 : i32
    return %c0_i32, %c0_i32_0, %c0_i32_1 : i32, i32, i32
  }
  func.func @transform_5(%arg0: i32) -> (i32, i32) {
    %c0_i32 = arith.constant 0 : i32
    %c0_i32_0 = arith.constant 0 : i32
    return %arg0, %c0_i32 : i32, i32
  }
}

</mosaic_0001>

<bundles_post_ra>
// kernel: tpu_custom_call.1
= control target key start
LH: loop header
LB: loop body
LE: loop exit
PB: predicated region body
PF: predicated region fallthrough
CT: control target
= control target key end

     0   :  { %10 = vsyncpa [#allocation3], 0  ;;  %s819_s0 = inlined_call_operand.hbm [shape: f32[8,16], index: 0, kind: input, shape index: {}]   ;;  %s820_s1 = inlined_call_operand.hbm [shape: f32[16,32], index: 1, kind: input, shape index: {}]   ;;  %s821_s2 = inlined_call_operand.vmem [shape: f32[1,32], index: 2, kind: input, shape index: {}]   ;;  %s822_s3 = inlined_call_operand.hbm [shape: f32[4,32,40], index: 3, kind: input, shape index: {}]   ;;  %s823_s4 = inlined_call_operand.vmem [shape: f32[4,1,40], index: 4, kind: input, shape index: {}]   ;;  %s824_s5 = inlined_call_operand.hbm [shape: f32[8,128], index: 5, kind: output, shape index: {}]  }
   0x1   :  { %11 = vsyncpa [#allocation6], 0 }
   0x2   :  { %12 = vsyncpa [#allocation4], 0  ;;  %s715_s18 = smov [#allocation5]  }
   0x3   :  { %s28_s19 = sshll.u32 %s715_s18, 4  ;;  %s29_s19 = int_to_ptr.vmem [resolvable:$true] %s28_s19 }
   0x4   :  { %s637_s20 = scalar_lea.vmem %s29_s19, 256  ;;  %p642_p1 = scmp.lt.s32.totalorder %s29_s19, %s29_s19 }
   0x5   :  { %p638_p0 = scmp.ne.s32.totalorder %s29_s19, %s637_s20  ;;  %p643_p2 = scmp.lt.s32.totalorder %s637_s20, %s637_s20 }
   0x7   :  { %p644_p3 = por %p643_p2, %p642_p1 }
   0x9   :  { %p645_p4 = pnand %p644_p3, %p638_p0 }
   0xb   :  { %648 = shalt.err (!%p645_p4)
}
   0xc   :  { %s716_s21 = smov 128   ;;  %s717_s22 = smov 8  }
   0xd   :  { %34 = dma.hbm_to_vmem [thread:$0]  %s820_s1, 256, %s29_s19, [#allocation6], %s716_s21, %s716_s21, %s717_s22  }
   0xe   :  { %s718_s25 = smov [#allocation2]   ;;  %s719_s27 = smov [#allocation7]  }
   0xf   :  { %s19_s26 = sshll.u32 %s718_s25, 4  ;;  %s42_s28 = sshll.u32 %s719_s27, 4  ;;  %s20_s26 = int_to_ptr.vmem [resolvable:$true] %s19_s26  ;;  %s43_s28 = int_to_ptr.vmem [resolvable:$true] %s42_s28 }
  0x10   :  { %s657_s29 = scalar_lea.vmem %s20_s26, 128  ;;  %p662_p6 = scmp.lt.s32.totalorder %s20_s26, %s20_s26 }
  0x11   :  { %p658_p5 = scmp.ne.s32.totalorder %s20_s26, %s657_s29  ;;  %p663_p7 = scmp.lt.s32.totalorder %s657_s29, %s657_s29 }
  0x13   :  { %p664_p8 = por %p663_p7, %p662_p6 }
  0x15   :  { %p665_p9 = pnand %p664_p8, %p658_p5 }
  0x17   :  { %668 = shalt.err (!%p665_p9)
}
  0x18   :  { %22 = dma.hbm_to_vmem [thread:$0]  %s819_s0, 128, %s20_s26, [#allocation3]  }
  0x19   :  { %s677_s7 = scalar_lea.vmem %s43_s28, 2048  ;;  %p682_p11 = scmp.lt.s32.totalorder %s43_s28, %s43_s28 }
  0x1a   :  { %p678_p10 = scmp.ne.s32.totalorder %s43_s28, %s677_s7  ;;  %p683_p12 = scmp.lt.s32.totalorder %s677_s7, %s677_s7 }
  0x1c   :  { %p684_p13 = por %p683_p12, %p682_p11 }
  0x1e   :  { %p685_p0 = pnand %p684_p13, %p678_p10 }
  0x20   :  { %688 = shalt.err (!%p685_p0)
}
  0x21   :  { %48 = dma.hbm_to_vmem [thread:$0]  %s822_s3, 2048, %s43_s28, [#allocation6], %s716_s21, %s716_s21, %s717_s22  }
  0x22   :  { %709 = dma.done.wait [#allocation3], 128  }
  0x23   :  { %710 = vsyncadd [#allocation3], 4294967168 }
  0x24   :  { %711 = dma.done.wait [#allocation6], 2304  }
  0x25   :  { %712 = vsyncadd [#allocation6], 4294964992  ;;  %v720_v0 = vmov 0.0   ;;  %vm721_vm0 = vmmov 0   ;;  %v62_v1 = vld [vmem:[#allocation5 + $0x8] sm:$0xff]  ;;  %v61_v2 = vld [vmem:[#allocation5] sm:$0xff] }
  0x26   :  { %566 = vmatprep.subr.mxu0 %v720_v0  ;;  %570 = vmatprep.mubr.msk.f32.mxu0 %vm721_vm0, %v720_v0  ;;  %v60_v3 = vld [vmem:[#allocation2] sm:$0xff]  ;;  %vm70_vm1 = vcmask 130048   ;;  %v148_v4 = vld [vmem:[#allocation7 + $0x18] sm:$0xff]  ;;  %v147_v5 = vld [vmem:[#allocation7 + $0x10] sm:$0xff]  ;;  %vm156_vm2 = vcmask 261120   ;;  %s722_s10 = smov 96  }
  0x27   :  { %573 = vmatprep.subr.mxu1 %v720_v0  ;;  %581 = vmatprep.mubr.msk.f32.mxu1 %vm721_vm0, %v720_v0  ;;  %v146_v6 = vld [vmem:[#allocation7 + $0x8] sm:$0xff]  ;;  %v145_v7 = vld [vmem:[#allocation7] sm:$0xff]  ;;  %v235_v8 = vld [vmem:[#allocation7 + $0x38] sm:$0xff]  ;;  %s723_s13 = smov 104   ;;  %s724_s16 = smov 112   ;;  %vm507_vm3 = vcmask 64512  }
  0x28   :  { %567 = vmatpush3.msra.mxu0 %v62_v1  ;;  %574 = vmatpush3.msra.mxu1 %v148_v4  ;;  %v530_v9 = vld [vmem:[%s821_s2] ss:$0 sm:$0xff]  ;;  %v234_v14 = vld [vmem:[#allocation7 + $0x30] sm:$0xff]  ;;  %v232_v16 = vld [vmem:[#allocation7 + $0x20] sm:$0xff]  ;;  %s725_s19 = smov 120   ;;  %vm510_vm4 = vcmask 195584  }
  0x29   :  { %568 = vmatprep.subr.mxu0 %v720_v0  ;;  %575 = vmatprep.subr.mxu1 %v720_v0  ;;  %v233_v15 = vld [vmem:[#allocation7 + $0x28] sm:$0xff]  ;;  %v322_v17 = vld [vmem:[#allocation7 + $0x58] sm:$0xff]  ;;  %v321_v23 = vld [vmem:[#allocation7 + $0x50] sm:$0xff]  ;;  %s726_s20 = smov [#allocation8]  }
  0x2a   :  { %569 = vmatpush3.msra.mxu0 %v61_v2  ;;  %576 = vmatpush3.msra.mxu1 %v147_v5  ;;  %v532_v18 = vld [vmem:[%s823_s4] ss:$0 sm:$0xff]  ;;  %v319_v25 = vld [vmem:[#allocation7 + $0x40] sm:$0xff]  ;;  %v409_v26 = vld [vmem:[#allocation7 + $0x78] sm:$0xff]  ;;  %s520_s21 = sshll.u32 %s726_s20, 4  ;;  %s521_s21 = int_to_ptr.vmem [resolvable:$true] %s520_s21 }
  0x2b   :  { %571 = vmatmul.mubr.msk.f32.vlgmr.msra.gmra.mxu0 %vm70_vm1, %v60_v3  ;;  %584 = vmatprep.subr.mxu0 %v720_v0  ;;  %v320_v24 = vld [vmem:[#allocation7 + $0x48] sm:$0xff]  ;;  %v408_v32 = vld [vmem:[#allocation7 + $0x70] sm:$0xff]  ;;  %v406_v34 = vld [vmem:[#allocation7 + $0x60] sm:$0xff]  ;;  %p694_p2 = scmp.lt.s32.totalorder %s521_s21, %s521_s21 }
  0x2c   :  { %592 = vmatprep.mubr.msk.f32.mxu0 %vm721_vm0, %v720_v0  ;;  %577 = vmatprep.subr.mxu1 %v720_v0  ;;  %v535_v27 = vld [vmem:[%s823_s4 + $0x1] ss:$0 sm:$0xff]  ;;  %v538_v35 = vld [vmem:[%s823_s4 + $0x2] ss:$0 sm:$0xff]  ;;  %v541_v40 = vld [vmem:[%s823_s4 + $0x3] ss:$0 sm:$0xff] }
  0x2d   :  { %578 = vmatpush3.msra.mxu1 %v146_v6  ;;  %585 = vmatpush3.msra.mxu0 %v235_v8  ;;  %v407_v33 = vld [vmem:[#allocation7 + $0x68] sm:$0xff]  ;;  %s689_s4 = scalar_lea.vmem %s521_s21, 128 }
  0x2e   :  { %579 = vmatprep.subr.mxu1 %v720_v0  ;;  %586 = vmatprep.subr.mxu0 %v720_v0  ;;  %p690_p1 = scmp.ne.s32.totalorder %s521_s21, %s689_s4  ;;  %p695_p3 = scmp.lt.s32.totalorder %s689_s4, %s689_s4 }
  0x2f   :  { %580 = vmatpush3.msra.mxu1 %v145_v7  ;;  %587 = vmatpush3.msra.mxu0 %v234_v14 }
  0x30   :  { %595 = vmatprep.subr.mxu1 %v720_v0  ;;  %588 = vmatprep.subr.mxu0 %v720_v0  ;;  %p696_p4 = por %p695_p3, %p694_p2 }
  0x31   :  { %589 = vmatpush3.msra.mxu0 %v233_v15 }
  0x32   :  { %590 = vmatprep.subr.mxu0 %v720_v0  ;;  %p697_p5 = pnand %p696_p4, %p690_p1 }
  0x33   :  { %591 = vmatpush3.msra.mxu0 %v232_v16 }
  0x34   :  { %606 = vmatprep.subr.mxu0 %v720_v0 }
  0xeb   :  { %v140_v10 = vpop.f32.mrf.mxu0 }
  0xec   :  { %v141_v11 = vadd.f32 %v530_v9, %v140_v10 }
  0xed   :  { %v572_v12 = vpop.f32.mrf.mxu0 }
  0xee   :  { %v144_v13 = vmax.f32 %v141_v11, 0.0 }
  0xf0   :  { %582 = vmatmul.mubr.msk.f32.vlgmr.msra.gmra.mxu1 %vm156_vm2, %v144_v13 }
  0xf1   :  { %603 = vmatprep.mubr.msk.f32.mxu1 %vm721_vm0, %v720_v0  ;;  %596 = vmatpush3.msra.mxu1 %v322_v17 }
  0xf2   :  { %597 = vmatprep.subr.mxu1 %v720_v0 }
  0xf3   :  { %598 = vmatpush3.msra.mxu1 %v321_v23 }
  0xf4   :  { %599 = vmatprep.subr.mxu1 %v720_v0 }
  0xf5   :  { %600 = vmatpush3.msra.mxu1 %v320_v24 }
  0xf6   :  { %601 = vmatprep.subr.mxu1 %v720_v0 }
  0xf7   :  { %602 = vmatpush3.msra.mxu1 %v319_v25 }
 0x1b0   :  { %v226_v19 = vpop.f32.mrf.mxu1 }
 0x1b1   :  { %v227_v20 = vadd.f32 %v532_v18, %v226_v19 }
 0x1b2   :  { %v583_v21 = vpop.f32.mrf.mxu1 }
 0x1b3   :  { %v230_v22 = vmax.f32 %v227_v20, 0.0  ;;  %492 = vrot.lane.b32.xlu0 %v227_v20, %s722_s10 }
 0x1b5   :  { %593 = vmatmul.mubr.msk.f32.vlgmr.msra.gmra.mxu0 %vm156_vm2, %v230_v22 }
 0x1b6   :  { %614 = vmatprep.mubr.msk.f32.mxu0 %vm721_vm0, %v720_v0  ;;  %607 = vmatpush3.msra.mxu0 %v409_v26 }
 0x1b7   :  { %608 = vmatprep.subr.mxu0 %v720_v0 }
 0x1b8   :  { %609 = vmatpush3.msra.mxu0 %v408_v32 }
 0x1b9   :  { %610 = vmatprep.subr.mxu0 %v720_v0 }
 0x1ba   :  { %611 = vmatpush3.msra.mxu0 %v407_v33 }
 0x1bb   :  { %612 = vmatprep.subr.mxu0 %v720_v0 }
 0x1bc   :  { %613 = vmatpush3.msra.mxu0 %v406_v34 }
 0x225   :  { %v493_v44 = vpop.permute.xlu0 %492 }
 0x275   :  { %v313_v28 = vpop.f32.mrf.mxu0 }
 0x276   :  { %v314_v29 = vadd.f32 %v535_v27, %v313_v28 }
 0x277   :  { %v594_v30 = vpop.f32.mrf.mxu0 }
 0x278   :  { %v317_v31 = vmax.f32 %v314_v29, 0.0  ;;  %496 = vrot.lane.b32.xlu0 %v314_v29, %s723_s13 }
 0x27a   :  { %604 = vmatmul.mubr.msk.f32.vlgmr.msra.gmra.mxu1 %vm156_vm2, %v317_v31 }
 0x2ea   :  { %v497_v45 = vpop.permute.xlu0 %496 }
 0x2eb   :  { %v508_v47 = vsel %vm507_vm3, %v493_v44, %v497_v45 }
 0x33a   :  { %v400_v36 = vpop.f32.mrf.mxu1 }
 0x33b   :  { %v401_v37 = vadd.f32 %v538_v35, %v400_v36 }
 0x33c   :  { %v605_v38 = vpop.f32.mrf.mxu1 }
 0x33d   :  { %v404_v39 = vmax.f32 %v401_v37, 0.0  ;;  %500 = vrot.lane.b32.xlu1 %v401_v37, %s724_s16 }
 0x33f   :  { %615 = vmatmul.mubr.msk.f32.vlgmr.msra.gmra.mxu0 %vm156_vm2, %v404_v39 }
 0x3af   :  { %v501_v46 = vpop.permute.xlu1 %500 }
 0x3b0   :  { %v509_v48 = vsel %vm70_vm1, %v508_v47, %v501_v46 }
 0x3ff   :  { %v487_v41 = vpop.f32.mrf.mxu0 }
 0x400   :  { %v488_v42 = vadd.f32 %v541_v40, %v487_v41 }
 0x401   :  { %v616_v43 = vpop.f32.mrf.mxu0 }
 0x402   :  { %504 = vrot.lane.b32.xlu1 %v488_v42, %s725_s19 }
 0x474   :  { %v505_v49 = vpop.permute.xlu1 %504 }
 0x475   :  { %v511_v50 = vsel %vm510_vm4, %v509_v48, %v505_v49 }
 0x476   :  { %v512_v51 = vsel %vm156_vm2, %v511_v50, 0.0 }
 0x477   :  { %513 = vst [vmem:[#allocation8] sm:$0xff] %v512_v51 }
 0x478   :  { %700 = shalt.err (!%p697_p5)
}
 0x479   :  { %523 = dma.vmem_to_hbm [thread:$0]  %s521_s21, 128, %s824_s5, [#allocation4]  }
 0x47a   :  { %713 = dma.done.wait [#allocation4], 128  }
 0x47b   :  { %714 = vsyncadd [#allocation4], 4294967168 }
 0x47c   :  { %527 = vsyncpa [#allocation3], 1 }
 0x47d   :  { %528 = vsyncpa [#allocation6], 1 }
 0x47e   :  { %529 = vsyncpa [#allocation4], 1 }

</bundles_post_ra>
